<compile_context>
chip_gen: v7x
topology: tpu7x:2x2x1
jax: 0.10.0
libtpu: 0.0.40
codegen_flags: <defaults>
</compile_context>

<pallas_src>
import functools

import jax
import jax.numpy as jnp
from jax.experimental import pallas as pl
from jax.experimental.pallas import tpu as pltpu


# ----------------------------------------------------------------------------
# Fused Pallas kernel: conv(3 heights, K-stacked) + ReLU + masked max-pool for
# both branches, then the full fusion MLP, all in one body.
# ----------------------------------------------------------------------------
def deeploc_kernel(r_ref, c_ref, w_r_ref, b_r_ref, w_c_ref, b_c_ref, thr_ref,
                   rec_ref, fre_ref, w1_ref, b1_ref, w2_ref, b2_ref,
                   w3_ref, b3_ref, o_ref):
    """Shapes:
      r_ref/c_ref : (B, S+8, D)   sequences zero-padded by 4 on each side of time
      w_*_ref     : (5, D, 3K)    h=3,4,5 conv weights stacked on K, tap-padded to 5
      b_*_ref     : (1, 3K)
      thr_ref     : (1, 3K) int32 first valid output row per column group
      rec/fre     : (B, 1)
      w1/b1       : (6K, 50) / (1, 50)      fusion_text
      w2/b2       : (1, 50)  / (1, 1)       fusion_text_2
      w3/b3       : (3, 128) / (1, 128)     fusion_final, lane-padded to 128
      o_ref       : (B, 128)   logits in lanes 0..1, zeros elsewhere
    """
    n3k = w_r_ref.shape[2]
    thr = thr_ref[...]                                     # (1, 3K)

    def conv_relu_maxpool(x_ref, w_ref, b_ref):
        bsz, lp, _ = x_ref.shape
        l_out = lp - 4                                     # common h_max = 5
        row = jax.lax.broadcasted_iota(jnp.int32, (l_out, n3k), 0)
        valid = row >= thr                                 # drop all-padding windows
        bias = b_ref[...]                                  # (1, 3K)
        rows = []
        for bi in range(bsz):                              # static unroll, tiny B
            x = x_ref[bi]                                  # (Lp, D)
            acc = jnp.zeros((l_out, n3k), jnp.float32)
            for t in range(5):                             # static taps
                acc = acc + jnp.dot(x[t:t + l_out, :], w_ref[t],
                                    preferred_element_type=jnp.float32)
            acc = jnp.maximum(acc + bias, 0.0)             # bias + ReLU
            acc = jnp.where(valid, acc, 0.0)               # ReLU>=0 -> 0-mask exact
            rows.append(jnp.max(acc, axis=0, keepdims=True))   # (1, 3K)
        return jnp.concatenate(rows, axis=0)               # (B, 3K)

    pooled = jnp.concatenate(
        [conv_relu_maxpool(r_ref, w_r_ref, b_r_ref),
         conv_relu_maxpool(c_ref, w_c_ref, b_c_ref)], axis=1)    # (B, 6K)

    # fusion_text -> fusion_text_2
    h1 = jnp.dot(pooled, w1_ref[...],
                 preferred_element_type=jnp.float32) + b1_ref[...]         # (B, 50)
    h2 = jnp.sum(h1 * w2_ref[...], axis=1, keepdims=True) + b2_ref[...]    # (B, 1)

    # fusion_final on concat([h2, rec, fre]); weights lane-padded to 128 lanes
    w3 = w3_ref[...]                                       # (3, 128)
    o_ref[...] = (h2 * w3[0:1, :]
                  + rec_ref[...] * w3[1:2, :]
                  + fre_ref[...] * w3[2:3, :]
                  + b3_ref[...])                           # (B, 128)


# ----------------------------------------------------------------------------
# Forward pass (glue: embedding gathers, padding, weight stacking) + kernel call
# ----------------------------------------------------------------------------
@jax.jit
def deeploc_forward(params, r_idx, c_idx, rec, fre):
    B = r_idx.shape[0]
    D = params["word_emb"].shape[1]
    K = params["r_cnn_1_b"].shape[1]

    # ---- report branch ----
    r_sum_word_idx = params["summary_emb"][r_idx].astype(jnp.int32)   # (B, S_sum)
    r_summary = params["word_emb"][r_sum_word_idx]                    # (B, S_sum, D)
    r_desc = params["desc_emb"][r_idx].reshape(B, -1, D)              # (B, S_desc, D)
    r_vec = jnp.concatenate([r_summary, r_desc], axis=1)              # (B, S_r, D)

    # ---- code branch ----
    c_line_idx = params["code_idx2line_idx"][c_idx].astype(jnp.int32)  # (B, n_lines)
    c_vec = params["line_idx2vec"][c_line_idx]                         # (B, S_c, D)

    # uniform time padding of max_h - 1 = 4 on both sides (one pad per branch)
    r_pad = jnp.pad(r_vec, ((0, 0), (4, 4), (0, 0)))
    c_pad = jnp.pad(c_vec, ((0, 0), (4, 4), (0, 0)))

    # stack h=3,4,5 conv weights along K (tap-padded to a common height of 5)
    def stack(prefix):
        ws, bs = [], []
        for n, h in enumerate((3, 4, 5)):
            w = params[f"{prefix}_cnn_{n + 1}_w"]                      # (h, D, K)
            ws.append(jnp.pad(w, ((0, 5 - h), (0, 0), (0, 0))))        # (5, D, K)
            bs.append(params[f"{prefix}_cnn_{n + 1}_b"])               # (1, K)
        return jnp.concatenate(ws, axis=2), jnp.concatenate(bs, axis=1)

    w_r, b_r = stack("r")                                              # (5,D,3K),(1,3K)
    w_c, b_c = stack("c")

    # first valid output row per column group (windows below it are pure padding)
    thr = jnp.concatenate(
        [jnp.full((1, K), 5 - h, jnp.int32) for h in (3, 4, 5)], axis=1)   # (1, 3K)

    # lane-pad fusion_final so the kernel writes a 128-lane-dense output slab
    w3p = jnp.pad(params["fusion_final_w"], ((0, 0), (0, 126)))        # (3, 128)
    b3p = jnp.pad(params["fusion_final_b"], ((0, 0), (0, 126)))        # (1, 128)

    vmem = pl.BlockSpec(memory_space=pltpu.MemorySpace.VMEM)
    # TODO(synk): if batch grows, tile B in multiples of 8 with a "parallel"
    # grid axis (dimension_semantics) so v7x's two TensorCores split the batch.
    out_pad = pl.pallas_call(
        deeploc_kernel,
        out_shape=jax.ShapeDtypeStruct((B, 128), jnp.float32),
        in_specs=[vmem] * 15,
        out_specs=vmem,
    )(r_pad, c_pad, w_r, b_r, w_c, b_c, thr,
      rec[:, None], fre[:, None],
      params["fusion_text_w"], params["fusion_text_b"],
      params["fusion_text_2_w"], params["fusion_text_2_b"],
      w3p, b3p)

    return out_pad[:, :2]


# ----------------------------------------------------------------------------
# Pure-JAX reference (mirrors the PyTorch forward) for a correctness check
# ----------------------------------------------------------------------------
def deeploc_reference(params, r_idx, c_idx, rec, fre):
    B = r_idx.shape[0]
    D = params["word_emb"].shape[1]
    r_sum_word_idx = params["summary_emb"][r_idx].astype(jnp.int32)
    r_summary = params["word_emb"][r_sum_word_idx]
    r_desc = params["desc_emb"][r_idx].reshape(B, -1, D)
    r_vec = jnp.concatenate([r_summary, r_desc], axis=1)
    c_line_idx = params["code_idx2line_idx"][c_idx].astype(jnp.int32)
    c_vec = params["line_idx2vec"][c_line_idx]

    pooled = []
    for x, prefix in ((r_vec, "r"), (c_vec, "c")):
        for n, h in enumerate((3, 4, 5)):
            w = params[f"{prefix}_cnn_{n + 1}_w"]            # (h, D, K)
            b = params[f"{prefix}_cnn_{n + 1}_b"]            # (1, K)
            xp = jnp.pad(x, ((0, 0), (h - 1, h - 1), (0, 0)))
            l_out = x.shape[1] + h - 1
            acc = jnp.zeros((B, l_out, w.shape[2]), jnp.float32)
            for t in range(h):
                acc = acc + jnp.einsum("bld,dk->blk", xp[:, t:t + l_out, :], w[t])
            acc = jax.nn.relu(acc + b)
            pooled.append(jnp.max(acc, axis=1))
    pooled = jnp.concatenate(pooled, axis=1)                 # (B, 6K)
    h1 = pooled @ params["fusion_text_w"] + params["fusion_text_b"]
    h2 = h1 @ params["fusion_text_2_w"].T + params["fusion_text_2_b"]
    cat = jnp.concatenate([h2, rec[:, None], fre[:, None]], axis=1)
    return cat @ params["fusion_final_w"] + params["fusion_final_b"]


# ----------------------------------------------------------------------------
# Deterministic parameter construction + demo
# ----------------------------------------------------------------------------
def make_params(key, *, n_reports, n_code, vocab, n_lines_total,
                s_sum, s_desc, n_lines, D, K):
    keys = jax.random.split(key, 32)
    ki = iter(keys)
    p = {}
    # frozen embedding tables (float tables, some hold integer indices)
    p["summary_emb"] = jax.random.randint(
        next(ki), (n_reports, s_sum), 0, vocab).astype(jnp.float32)
    p["desc_emb"] = 0.1 * jax.random.normal(next(ki), (n_reports, s_desc * D),
                                            jnp.float32)
    p["code_idx2line_idx"] = jax.random.randint(
        next(ki), (n_code, n_lines), 0, n_lines_total).astype(jnp.float32)
    p["line_idx2vec"] = 0.1 * jax.random.normal(next(ki), (n_lines_total, D),
                                                jnp.float32)
    p["word_emb"] = 0.1 * jax.random.normal(next(ki), (vocab, D), jnp.float32)
    p["word_emb"] = p["word_emb"].at[0].set(0.0)             # padding_idx=0

    # conv weights: PyTorch (K, 1, h, D) stored here as (h, D, K)
    for prefix in ("r", "c"):
        for n, h in enumerate((3, 4, 5)):
            p[f"{prefix}_cnn_{n + 1}_w"] = 0.1 * jax.random.normal(
                next(ki), (h, D, K), jnp.float32)
            p[f"{prefix}_cnn_{n + 1}_b"] = 0.1 * jax.random.normal(
                next(ki), (1, K), jnp.float32)

    # fusion linears (stored transposed for x @ W)
    p["fusion_text_w"] = 0.1 * jax.random.normal(next(ki), (6 * K, 50), jnp.float32)
    p["fusion_text_b"] = 0.1 * jax.random.normal(next(ki), (1, 50), jnp.float32)
    p["fusion_text_2_w"] = 0.1 * jax.random.normal(next(ki), (1, 50), jnp.float32)
    p["fusion_text_2_b"] = 0.1 * jax.random.normal(next(ki), (1, 1), jnp.float32)
    p["fusion_final_w"] = 0.1 * jax.random.normal(next(ki), (3, 2), jnp.float32)
    p["fusion_final_b"] = 0.1 * jax.random.normal(next(ki), (1, 2), jnp.float32)
    return p


if __name__ == "__main__":
    # small, shape-consistent configuration
    B = 2
    D = 16            # embedding_dim (word_emb.shape[1] == line_idx2vec.shape[1])
    K = 8             # n_kernels
    n_reports, n_code = 10, 12
    vocab, n_lines_total = 50, 30
    s_sum, s_desc, n_lines = 6, 4, 8

    key = jax.random.PRNGKey(0)
    pkey, ikey = jax.random.split(key)
    params = make_params(pkey, n_reports=n_reports, n_code=n_code, vocab=vocab,
                         n_lines_total=n_lines_total, s_sum=s_sum, s_desc=s_desc,
                         n_lines=n_lines, D=D, K=K)

    k1, k2, k3, k4 = jax.random.split(ikey, 4)
    r_idx = jax.random.randint(k1, (B,), 0, n_reports)
    c_idx = jax.random.randint(k2, (B,), 0, n_code)
    rec = jax.random.normal(k3, (B,), jnp.float32)
    fre = jax.random.normal(k4, (B,), jnp.float32)

    out = deeploc_forward(params, r_idx, c_idx, rec, fre)
    out = jax.block_until_ready(out)
    assert out.shape == (B, 2) and out.dtype == jnp.float32

    ref = deeploc_reference(params, r_idx, c_idx, rec, fre)
    assert jnp.allclose(out, ref, atol=1e-3, rtol=1e-3), (out, ref)

    print("KERNEL_OK")
</pallas_src>

<mosaic_0001>
module attributes {stable_mosaic.version = 11 : i64} {
  func.func @deeploc_kernel(%arg0: memref<2x18x16xf32, #tpu.memory_space<vmem>>, %arg1: memref<2x16x16xf32, #tpu.memory_space<vmem>>, %arg2: memref<5x16x24xf32, #tpu.memory_space<vmem>>, %arg3: memref<1x24xf32, #tpu.memory_space<vmem>>, %arg4: memref<5x16x24xf32, #tpu.memory_space<vmem>>, %arg5: memref<1x24xf32, #tpu.memory_space<vmem>>, %arg6: memref<1x24xi32, #tpu.memory_space<vmem>>, %arg7: memref<2x1xf32, #tpu.memory_space<vmem>>, %arg8: memref<2x1xf32, #tpu.memory_space<vmem>>, %arg9: memref<48x50xf32, #tpu.memory_space<vmem>>, %arg10: memref<1x50xf32, #tpu.memory_space<vmem>>, %arg11: memref<1x50xf32, #tpu.memory_space<vmem>>, %arg12: memref<1x1xf32, #tpu.memory_space<vmem>>, %arg13: memref<3x128xf32, #tpu.memory_space<vmem>>, %arg14: memref<1x128xf32, #tpu.memory_space<vmem>>, %arg15: memref<2x128xf32, #tpu.memory_space<vmem>>) attributes {dimension_semantics = [], scalar_prefetch = 0 : i64, scratch_operands = 0 : i64, tpu.core_type = #tpu.core_type<tc>} {
    %c0 = arith.constant 0 : index
    %c0_0 = arith.constant 0 : index
    %0 = vector.load %arg6[%c0, %c0_0] : memref<1x24xi32, #tpu.memory_space<vmem>>, vector<1x24xi32>
    %1 = tpu.iota {dimensions = array<i32: 0>} : vector<14x24xi32>
    %2 = vector.broadcast %0 : vector<1x24xi32> to vector<14x24xi32>
    %3 = arith.cmpi sge, %1, %2 : vector<14x24xi32>
    %c0_1 = arith.constant 0 : index
    %c0_2 = arith.constant 0 : index
    %4 = vector.load %arg3[%c0_1, %c0_2] : memref<1x24xf32, #tpu.memory_space<vmem>>, vector<1x24xf32>
    %c0_3 = arith.constant 0 : index
    %c0_4 = arith.constant 0 : index
    %c0_5 = arith.constant 0 : index
    %5 = vector.load %arg0[%c0_3, %c0_4, %c0_5] : memref<2x18x16xf32, #tpu.memory_space<vmem>>, vector<1x18x16xf32>
    %6 = vector.shape_cast %5 : vector<1x18x16xf32> to vector<18x16xf32>
    %cst = arith.constant 0.000000e+00 : f32
    %7 = vector.broadcast %cst : f32 to vector<14x24xf32>
    %8 = vector.extract_strided_slice %6 {offsets = [0, 0], sizes = [14, 16], strides = [1, 1]} : vector<18x16xf32> to vector<14x16xf32>
    %c0_6 = arith.constant 0 : index
    %c0_7 = arith.constant 0 : index
    %c0_8 = arith.constant 0 : index
    %9 = vector.load %arg2[%c0_6, %c0_7, %c0_8] : memref<5x16x24xf32, #tpu.memory_space<vmem>>, vector<1x16x24xf32>
    %10 = vector.shape_cast %9 : vector<1x16x24xf32> to vector<16x24xf32>
    %cst_9 = arith.constant dense<0.000000e+00> : vector<14x24xf32>
    %11 = tpu.matmul %8, %10, %cst_9 {dimension_numbers = #tpu.dot_dimension_numbers<[1], [0], [0], [1], [0, 0, 1, 1], [], []>} : vector<14x16xf32>, vector<16x24xf32>, vector<14x24xf32> -> vector<14x24xf32>
    %12 = arith.addf %7, %11 : vector<14x24xf32>
    %13 = vector.extract_strided_slice %6 {offsets = [1, 0], sizes = [14, 16], strides = [1, 1]} : vector<18x16xf32> to vector<14x16xf32>
    %c1 = arith.constant 1 : index
    %c0_10 = arith.constant 0 : index
    %c0_11 = arith.constant 0 : index
    %14 = vector.load %arg2[%c1, %c0_10, %c0_11] : memref<5x16x24xf32, #tpu.memory_space<vmem>>, vector<1x16x24xf32>
    %15 = vector.shape_cast %14 : vector<1x16x24xf32> to vector<16x24xf32>
    %cst_12 = arith.constant dense<0.000000e+00> : vector<14x24xf32>
    %16 = tpu.matmul %13, %15, %cst_12 {dimension_numbers = #tpu.dot_dimension_numbers<[1], [0], [0], [1], [0, 0, 1, 1], [], []>} : vector<14x16xf32>, vector<16x24xf32>, vector<14x24xf32> -> vector<14x24xf32>
    %17 = arith.addf %12, %16 : vector<14x24xf32>
    %18 = vector.extract_strided_slice %6 {offsets = [2, 0], sizes = [14, 16], strides = [1, 1]} : vector<18x16xf32> to vector<14x16xf32>
    %c2 = arith.constant 2 : index
    %c0_13 = arith.constant 0 : index
    %c0_14 = arith.constant 0 : index
    %19 = vector.load %arg2[%c2, %c0_13, %c0_14] : memref<5x16x24xf32, #tpu.memory_space<vmem>>, vector<1x16x24xf32>
    %20 = vector.shape_cast %19 : vector<1x16x24xf32> to vector<16x24xf32>
    %cst_15 = arith.constant dense<0.000000e+00> : vector<14x24xf32>
    %21 = tpu.matmul %18, %20, %cst_15 {dimension_numbers = #tpu.dot_dimension_numbers<[1], [0], [0], [1], [0, 0, 1, 1], [], []>} : vector<14x16xf32>, vector<16x24xf32>, vector<14x24xf32> -> vector<14x24xf32>
    %22 = arith.addf %17, %21 : vector<14x24xf32>
    %23 = vector.extract_strided_slice %6 {offsets = [3, 0], sizes = [14, 16], strides = [1, 1]} : vector<18x16xf32> to vector<14x16xf32>
    %c3 = arith.constant 3 : index
    %c0_16 = arith.constant 0 : index
    %c0_17 = arith.constant 0 : index
    %24 = vector.load %arg2[%c3, %c0_16, %c0_17] : memref<5x16x24xf32, #tpu.memory_space<vmem>>, vector<1x16x24xf32>
    %25 = vector.shape_cast %24 : vector<1x16x24xf32> to vector<16x24xf32>
    %cst_18 = arith.constant dense<0.000000e+00> : vector<14x24xf32>
    %26 = tpu.matmul %23, %25, %cst_18 {dimension_numbers = #tpu.dot_dimension_numbers<[1], [0], [0], [1], [0, 0, 1, 1], [], []>} : vector<14x16xf32>, vector<16x24xf32>, vector<14x24xf32> -> vector<14x24xf32>
    %27 = arith.addf %22, %26 : vector<14x24xf32>
    %28 = vector.extract_strided_slice %6 {offsets = [4, 0], sizes = [14, 16], strides = [1, 1]} : vector<18x16xf32> to vector<14x16xf32>
    %c4 = arith.constant 4 : index
    %c0_19 = arith.constant 0 : index
    %c0_20 = arith.constant 0 : index
    %29 = vector.load %arg2[%c4, %c0_19, %c0_20] : memref<5x16x24xf32, #tpu.memory_space<vmem>>, vector<1x16x24xf32>
    %30 = vector.shape_cast %29 : vector<1x16x24xf32> to vector<16x24xf32>
    %cst_21 = arith.constant dense<0.000000e+00> : vector<14x24xf32>
    %31 = tpu.matmul %28, %30, %cst_21 {dimension_numbers = #tpu.dot_dimension_numbers<[1], [0], [0], [1], [0, 0, 1, 1], [], []>} : vector<14x16xf32>, vector<16x24xf32>, vector<14x24xf32> -> vector<14x24xf32>
    %32 = arith.addf %27, %31 : vector<14x24xf32>
    %33 = vector.broadcast %4 : vector<1x24xf32> to vector<14x24xf32>
    %34 = arith.addf %32, %33 : vector<14x24xf32>
    %cst_22 = arith.constant 0.000000e+00 : f32
    %35 = vector.broadcast %cst_22 : f32 to vector<14x24xf32>
    %36 = arith.maximumf %34, %35 : vector<14x24xf32>
    %cst_23 = arith.constant 0.000000e+00 : f32
    %37 = vector.broadcast %cst_23 : f32 to vector<14x24xf32>
    %38 = arith.select %3, %36, %37 : vector<14x24xi1>, vector<14x24xf32>
    %cst_24 = arith.constant dense<0xFF800000> : vector<24xf32>
    %39 = vector.multi_reduction <maximumf>, %38, %cst_24 [0] : vector<14x24xf32> to vector<24xf32>
    %40 = vector.shape_cast %39 : vector<24xf32> to vector<1x24xf32>
    %c1_25 = arith.constant 1 : index
    %c0_26 = arith.constant 0 : index
    %c0_27 = arith.constant 0 : index
    %41 = vector.load %arg0[%c1_25, %c0_26, %c0_27] : memref<2x18x16xf32, #tpu.memory_space<vmem>>, vector<1x18x16xf32>
    %42 = vector.shape_cast %41 : vector<1x18x16xf32> to vector<18x16xf32>
    %cst_28 = arith.constant 0.000000e+00 : f32
    %43 = vector.broadcast %cst_28 : f32 to vector<14x24xf32>
    %44 = vector.extract_strided_slice %42 {offsets = [0, 0], sizes = [14, 16], strides = [1, 1]} : vector<18x16xf32> to vector<14x16xf32>
    %c0_29 = arith.constant 0 : index
    %c0_30 = arith.constant 0 : index
    %c0_31 = arith.constant 0 : index
    %45 = vector.load %arg2[%c0_29, %c0_30, %c0_31] : memref<5x16x24xf32, #tpu.memory_space<vmem>>, vector<1x16x24xf32>
    %46 = vector.shape_cast %45 : vector<1x16x24xf32> to vector<16x24xf32>
    %cst_32 = arith.constant dense<0.000000e+00> : vector<14x24xf32>
    %47 = tpu.matmul %44, %46, %cst_32 {dimension_numbers = #tpu.dot_dimension_numbers<[1], [0], [0], [1], [0, 0, 1, 1], [], []>} : vector<14x16xf32>, vector<16x24xf32>, vector<14x24xf32> -> vector<14x24xf32>
    %48 = arith.addf %43, %47 : vector<14x24xf32>
    %49 = vector.extract_strided_slice %42 {offsets = [1, 0], sizes = [14, 16], strides = [1, 1]} : vector<18x16xf32> to vector<14x16xf32>
    %c1_33 = arith.constant 1 : index
    %c0_34 = arith.constant 0 : index
    %c0_35 = arith.constant 0 : index
    %50 = vector.load %arg2[%c1_33, %c0_34, %c0_35] : memref<5x16x24xf32, #tpu.memory_space<vmem>>, vector<1x16x24xf32>
    %51 = vector.shape_cast %50 : vector<1x16x24xf32> to vector<16x24xf32>
    %cst_36 = arith.constant dense<0.000000e+00> : vector<14x24xf32>
    %52 = tpu.matmul %49, %51, %cst_36 {dimension_numbers = #tpu.dot_dimension_numbers<[1], [0], [0], [1], [0, 0, 1, 1], [], []>} : vector<14x16xf32>, vector<16x24xf32>, vector<14x24xf32> -> vector<14x24xf32>
    %53 = arith.addf %48, %52 : vector<14x24xf32>
    %54 = vector.extract_strided_slice %42 {offsets = [2, 0], sizes = [14, 16], strides = [1, 1]} : vector<18x16xf32> to vector<14x16xf32>
    %c2_37 = arith.constant 2 : index
    %c0_38 = arith.constant 0 : index
    %c0_39 = arith.constant 0 : index
    %55 = vector.load %arg2[%c2_37, %c0_38, %c0_39] : memref<5x16x24xf32, #tpu.memory_space<vmem>>, vector<1x16x24xf32>
    %56 = vector.shape_cast %55 : vector<1x16x24xf32> to vector<16x24xf32>
    %cst_40 = arith.constant dense<0.000000e+00> : vector<14x24xf32>
    %57 = tpu.matmul %54, %56, %cst_40 {dimension_numbers = #tpu.dot_dimension_numbers<[1], [0], [0], [1], [0, 0, 1, 1], [], []>} : vector<14x16xf32>, vector<16x24xf32>, vector<14x24xf32> -> vector<14x24xf32>
    %58 = arith.addf %53, %57 : vector<14x24xf32>
    %59 = vector.extract_strided_slice %42 {offsets = [3, 0], sizes = [14, 16], strides = [1, 1]} : vector<18x16xf32> to vector<14x16xf32>
    %c3_41 = arith.constant 3 : index
    %c0_42 = arith.constant 0 : index
    %c0_43 = arith.constant 0 : index
    %60 = vector.load %arg2[%c3_41, %c0_42, %c0_43] : memref<5x16x24xf32, #tpu.memory_space<vmem>>, vector<1x16x24xf32>
    %61 = vector.shape_cast %60 : vector<1x16x24xf32> to vector<16x24xf32>
    %cst_44 = arith.constant dense<0.000000e+00> : vector<14x24xf32>
    %62 = tpu.matmul %59, %61, %cst_44 {dimension_numbers = #tpu.dot_dimension_numbers<[1], [0], [0], [1], [0, 0, 1, 1], [], []>} : vector<14x16xf32>, vector<16x24xf32>, vector<14x24xf32> -> vector<14x24xf32>
    %63 = arith.addf %58, %62 : vector<14x24xf32>
    %64 = vector.extract_strided_slice %42 {offsets = [4, 0], sizes = [14, 16], strides = [1, 1]} : vector<18x16xf32> to vector<14x16xf32>
    %c4_45 = arith.constant 4 : index
    %c0_46 = arith.constant 0 : index
    %c0_47 = arith.constant 0 : index
    %65 = vector.load %arg2[%c4_45, %c0_46, %c0_47] : memref<5x16x24xf32, #tpu.memory_space<vmem>>, vector<1x16x24xf32>
    %66 = vector.shape_cast %65 : vector<1x16x24xf32> to vector<16x24xf32>
    %cst_48 = arith.constant dense<0.000000e+00> : vector<14x24xf32>
    %67 = tpu.matmul %64, %66, %cst_48 {dimension_numbers = #tpu.dot_dimension_numbers<[1], [0], [0], [1], [0, 0, 1, 1], [], []>} : vector<14x16xf32>, vector<16x24xf32>, vector<14x24xf32> -> vector<14x24xf32>
    %68 = arith.addf %63, %67 : vector<14x24xf32>
    %69 = vector.broadcast %4 : vector<1x24xf32> to vector<14x24xf32>
    %70 = arith.addf %68, %69 : vector<14x24xf32>
    %cst_49 = arith.constant 0.000000e+00 : f32
    %71 = vector.broadcast %cst_49 : f32 to vector<14x24xf32>
    %72 = arith.maximumf %70, %71 : vector<14x24xf32>
    %cst_50 = arith.constant 0.000000e+00 : f32
    %73 = vector.broadcast %cst_50 : f32 to vector<14x24xf32>
    %74 = arith.select %3, %72, %73 : vector<14x24xi1>, vector<14x24xf32>
    %cst_51 = arith.constant dense<0xFF800000> : vector<24xf32>
    %75 = vector.multi_reduction <maximumf>, %74, %cst_51 [0] : vector<14x24xf32> to vector<24xf32>
    %76 = vector.shape_cast %75 : vector<24xf32> to vector<1x24xf32>
    %77 = tpu.concatenate %40, %76 in 0 : vector<1x24xf32>, vector<1x24xf32> -> vector<2x24xf32>
    %78 = tpu.iota {dimensions = array<i32: 0>} : vector<12x24xi32>
    %79 = vector.broadcast %0 : vector<1x24xi32> to vector<12x24xi32>
    %80 = arith.cmpi sge, %78, %79 : vector<12x24xi32>
    %c0_52 = arith.constant 0 : index
    %c0_53 = arith.constant 0 : index
    %81 = vector.load %arg5[%c0_52, %c0_53] : memref<1x24xf32, #tpu.memory_space<vmem>>, vector<1x24xf32>
    %c0_54 = arith.constant 0 : index
    %c0_55 = arith.constant 0 : index
    %c0_56 = arith.constant 0 : index
    %82 = vector.load %arg1[%c0_54, %c0_55, %c0_56] : memref<2x16x16xf32, #tpu.memory_space<vmem>>, vector<1x16x16xf32>
    %83 = vector.shape_cast %82 : vector<1x16x16xf32> to vector<16x16xf32>
    %cst_57 = arith.constant 0.000000e+00 : f32
    %84 = vector.broadcast %cst_57 : f32 to vector<12x24xf32>
    %85 = vector.extract_strided_slice %83 {offsets = [0, 0], sizes = [12, 16], strides = [1, 1]} : vector<16x16xf32> to vector<12x16xf32>
    %c0_58 = arith.constant 0 : index
    %c0_59 = arith.constant 0 : index
    %c0_60 = arith.constant 0 : index
    %86 = vector.load %arg4[%c0_58, %c0_59, %c0_60] : memref<5x16x24xf32, #tpu.memory_space<vmem>>, vector<1x16x24xf32>
    %87 = vector.shape_cast %86 : vector<1x16x24xf32> to vector<16x24xf32>
    %cst_61 = arith.constant dense<0.000000e+00> : vector<12x24xf32>
    %88 = tpu.matmul %85, %87, %cst_61 {dimension_numbers = #tpu.dot_dimension_numbers<[1], [0], [0], [1], [0, 0, 1, 1], [], []>} : vector<12x16xf32>, vector<16x24xf32>, vector<12x24xf32> -> vector<12x24xf32>
    %89 = arith.addf %84, %88 : vector<12x24xf32>
    %90 = vector.extract_strided_slice %83 {offsets = [1, 0], sizes = [12, 16], strides = [1, 1]} : vector<16x16xf32> to vector<12x16xf32>
    %c1_62 = arith.constant 1 : index
    %c0_63 = arith.constant 0 : index
    %c0_64 = arith.constant 0 : index
    %91 = vector.load %arg4[%c1_62, %c0_63, %c0_64] : memref<5x16x24xf32, #tpu.memory_space<vmem>>, vector<1x16x24xf32>
    %92 = vector.shape_cast %91 : vector<1x16x24xf32> to vector<16x24xf32>
    %cst_65 = arith.constant dense<0.000000e+00> : vector<12x24xf32>
    %93 = tpu.matmul %90, %92, %cst_65 {dimension_numbers = #tpu.dot_dimension_numbers<[1], [0], [0], [1], [0, 0, 1, 1], [], []>} : vector<12x16xf32>, vector<16x24xf32>, vector<12x24xf32> -> vector<12x24xf32>
    %94 = arith.addf %89, %93 : vector<12x24xf32>
    %95 = vector.extract_strided_slice %83 {offsets = [2, 0], sizes = [12, 16], strides = [1, 1]} : vector<16x16xf32> to vector<12x16xf32>
    %c2_66 = arith.constant 2 : index
    %c0_67 = arith.constant 0 : index
    %c0_68 = arith.constant 0 : index
    %96 = vector.load %arg4[%c2_66, %c0_67, %c0_68] : memref<5x16x24xf32, #tpu.memory_space<vmem>>, vector<1x16x24xf32>
    %97 = vector.shape_cast %96 : vector<1x16x24xf32> to vector<16x24xf32>
    %cst_69 = arith.constant dense<0.000000e+00> : vector<12x24xf32>
    %98 = tpu.matmul %95, %97, %cst_69 {dimension_numbers = #tpu.dot_dimension_numbers<[1], [0], [0], [1], [0, 0, 1, 1], [], []>} : vector<12x16xf32>, vector<16x24xf32>, vector<12x24xf32> -> vector<12x24xf32>
    %99 = arith.addf %94, %98 : vector<12x24xf32>
    %100 = vector.extract_strided_slice %83 {offsets = [3, 0], sizes = [12, 16], strides = [1, 1]} : vector<16x16xf32> to vector<12x16xf32>
    %c3_70 = arith.constant 3 : index
    %c0_71 = arith.constant 0 : index
    %c0_72 = arith.constant 0 : index
    %101 = vector.load %arg4[%c3_70, %c0_71, %c0_72] : memref<5x16x24xf32, #tpu.memory_space<vmem>>, vector<1x16x24xf32>
    %102 = vector.shape_cast %101 : vector<1x16x24xf32> to vector<16x24xf32>
    %cst_73 = arith.constant dense<0.000000e+00> : vector<12x24xf32>
    %103 = tpu.matmul %100, %102, %cst_73 {dimension_numbers = #tpu.dot_dimension_numbers<[1], [0], [0], [1], [0, 0, 1, 1], [], []>} : vector<12x16xf32>, vector<16x24xf32>, vector<12x24xf32> -> vector<12x24xf32>
    %104 = arith.addf %99, %103 : vector<12x24xf32>
    %105 = vector.extract_strided_slice %83 {offsets = [4, 0], sizes = [12, 16], strides = [1, 1]} : vector<16x16xf32> to vector<12x16xf32>
    %c4_74 = arith.constant 4 : index
    %c0_75 = arith.constant 0 : index
    %c0_76 = arith.constant 0 : index
    %106 = vector.load %arg4[%c4_74, %c0_75, %c0_76] : memref<5x16x24xf32, #tpu.memory_space<vmem>>, vector<1x16x24xf32>
    %107 = vector.shape_cast %106 : vector<1x16x24xf32> to vector<16x24xf32>
    %cst_77 = arith.constant dense<0.000000e+00> : vector<12x24xf32>
    %108 = tpu.matmul %105, %107, %cst_77 {dimension_numbers = #tpu.dot_dimension_numbers<[1], [0], [0], [1], [0, 0, 1, 1], [], []>} : vector<12x16xf32>, vector<16x24xf32>, vector<12x24xf32> -> vector<12x24xf32>
    %109 = arith.addf %104, %108 : vector<12x24xf32>
    %110 = vector.broadcast %81 : vector<1x24xf32> to vector<12x24xf32>
    %111 = arith.addf %109, %110 : vector<12x24xf32>
    %cst_78 = arith.constant 0.000000e+00 : f32
    %112 = vector.broadcast %cst_78 : f32 to vector<12x24xf32>
    %113 = arith.maximumf %111, %112 : vector<12x24xf32>
    %cst_79 = arith.constant 0.000000e+00 : f32
    %114 = vector.broadcast %cst_79 : f32 to vector<12x24xf32>
    %115 = arith.select %80, %113, %114 : vector<12x24xi1>, vector<12x24xf32>
    %cst_80 = arith.constant dense<0xFF800000> : vector<24xf32>
    %116 = vector.multi_reduction <maximumf>, %115, %cst_80 [0] : vector<12x24xf32> to vector<24xf32>
    %117 = vector.shape_cast %116 : vector<24xf32> to vector<1x24xf32>
    %c1_81 = arith.constant 1 : index
    %c0_82 = arith.constant 0 : index
    %c0_83 = arith.constant 0 : index
    %118 = vector.load %arg1[%c1_81, %c0_82, %c0_83] : memref<2x16x16xf32, #tpu.memory_space<vmem>>, vector<1x16x16xf32>
    %119 = vector.shape_cast %118 : vector<1x16x16xf32> to vector<16x16xf32>
    %cst_84 = arith.constant 0.000000e+00 : f32
    %120 = vector.broadcast %cst_84 : f32 to vector<12x24xf32>
    %121 = vector.extract_strided_slice %119 {offsets = [0, 0], sizes = [12, 16], strides = [1, 1]} : vector<16x16xf32> to vector<12x16xf32>
    %c0_85 = arith.constant 0 : index
    %c0_86 = arith.constant 0 : index
    %c0_87 = arith.constant 0 : index
    %122 = vector.load %arg4[%c0_85, %c0_86, %c0_87] : memref<5x16x24xf32, #tpu.memory_space<vmem>>, vector<1x16x24xf32>
    %123 = vector.shape_cast %122 : vector<1x16x24xf32> to vector<16x24xf32>
    %cst_88 = arith.constant dense<0.000000e+00> : vector<12x24xf32>
    %124 = tpu.matmul %121, %123, %cst_88 {dimension_numbers = #tpu.dot_dimension_numbers<[1], [0], [0], [1], [0, 0, 1, 1], [], []>} : vector<12x16xf32>, vector<16x24xf32>, vector<12x24xf32> -> vector<12x24xf32>
    %125 = arith.addf %120, %124 : vector<12x24xf32>
    %126 = vector.extract_strided_slice %119 {offsets = [1, 0], sizes = [12, 16], strides = [1, 1]} : vector<16x16xf32> to vector<12x16xf32>
    %c1_89 = arith.constant 1 : index
    %c0_90 = arith.constant 0 : index
    %c0_91 = arith.constant 0 : index
    %127 = vector.load %arg4[%c1_89, %c0_90, %c0_91] : memref<5x16x24xf32, #tpu.memory_space<vmem>>, vector<1x16x24xf32>
    %128 = vector.shape_cast %127 : vector<1x16x24xf32> to vector<16x24xf32>
    %cst_92 = arith.constant dense<0.000000e+00> : vector<12x24xf32>
    %129 = tpu.matmul %126, %128, %cst_92 {dimension_numbers = #tpu.dot_dimension_numbers<[1], [0], [0], [1], [0, 0, 1, 1], [], []>} : vector<12x16xf32>, vector<16x24xf32>, vector<12x24xf32> -> vector<12x24xf32>
    %130 = arith.addf %125, %129 : vector<12x24xf32>
    %131 = vector.extract_strided_slice %119 {offsets = [2, 0], sizes = [12, 16], strides = [1, 1]} : vector<16x16xf32> to vector<12x16xf32>
    %c2_93 = arith.constant 2 : index
    %c0_94 = arith.constant 0 : index
    %c0_95 = arith.constant 0 : index
    %132 = vector.load %arg4[%c2_93, %c0_94, %c0_95] : memref<5x16x24xf32, #tpu.memory_space<vmem>>, vector<1x16x24xf32>
    %133 = vector.shape_cast %132 : vector<1x16x24xf32> to vector<16x24xf32>
    %cst_96 = arith.constant dense<0.000000e+00> : vector<12x24xf32>
    %134 = tpu.matmul %131, %133, %cst_96 {dimension_numbers = #tpu.dot_dimension_numbers<[1], [0], [0], [1], [0, 0, 1, 1], [], []>} : vector<12x16xf32>, vector<16x24xf32>, vector<12x24xf32> -> vector<12x24xf32>
    %135 = arith.addf %130, %134 : vector<12x24xf32>
    %136 = vector.extract_strided_slice %119 {offsets = [3, 0], sizes = [12, 16], strides = [1, 1]} : vector<16x16xf32> to vector<12x16xf32>
    %c3_97 = arith.constant 3 : index
    %c0_98 = arith.constant 0 : index
    %c0_99 = arith.constant 0 : index
    %137 = vector.load %arg4[%c3_97, %c0_98, %c0_99] : memref<5x16x24xf32, #tpu.memory_space<vmem>>, vector<1x16x24xf32>
    %138 = vector.shape_cast %137 : vector<1x16x24xf32> to vector<16x24xf32>
    %cst_100 = arith.constant dense<0.000000e+00> : vector<12x24xf32>
    %139 = tpu.matmul %136, %138, %cst_100 {dimension_numbers = #tpu.dot_dimension_numbers<[1], [0], [0], [1], [0, 0, 1, 1], [], []>} : vector<12x16xf32>, vector<16x24xf32>, vector<12x24xf32> -> vector<12x24xf32>
    %140 = arith.addf %135, %139 : vector<12x24xf32>
    %141 = vector.extract_strided_slice %119 {offsets = [4, 0], sizes = [12, 16], strides = [1, 1]} : vector<16x16xf32> to vector<12x16xf32>
    %c4_101 = arith.constant 4 : index
    %c0_102 = arith.constant 0 : index
    %c0_103 = arith.constant 0 : index
    %142 = vector.load %arg4[%c4_101, %c0_102, %c0_103] : memref<5x16x24xf32, #tpu.memory_space<vmem>>, vector<1x16x24xf32>
    %143 = vector.shape_cast %142 : vector<1x16x24xf32> to vector<16x24xf32>
    %cst_104 = arith.constant dense<0.000000e+00> : vector<12x24xf32>
    %144 = tpu.matmul %141, %143, %cst_104 {dimension_numbers = #tpu.dot_dimension_numbers<[1], [0], [0], [1], [0, 0, 1, 1], [], []>} : vector<12x16xf32>, vector<16x24xf32>, vector<12x24xf32> -> vector<12x24xf32>
    %145 = arith.addf %140, %144 : vector<12x24xf32>
    %146 = vector.broadcast %81 : vector<1x24xf32> to vector<12x24xf32>
    %147 = arith.addf %145, %146 : vector<12x24xf32>
    %cst_105 = arith.constant 0.000000e+00 : f32
    %148 = vector.broadcast %cst_105 : f32 to vector<12x24xf32>
    %149 = arith.maximumf %147, %148 : vector<12x24xf32>
    %cst_106 = arith.constant 0.000000e+00 : f32
    %150 = vector.broadcast %cst_106 : f32 to vector<12x24xf32>
    %151 = arith.select %80, %149, %150 : vector<12x24xi1>, vector<12x24xf32>
    %cst_107 = arith.constant dense<0xFF800000> : vector<24xf32>
    %152 = vector.multi_reduction <maximumf>, %151, %cst_107 [0] : vector<12x24xf32> to vector<24xf32>
    %153 = vector.shape_cast %152 : vector<24xf32> to vector<1x24xf32>
    %154 = tpu.concatenate %117, %153 in 0 : vector<1x24xf32>, vector<1x24xf32> -> vector<2x24xf32>
    %155 = tpu.concatenate %77, %154 in 1 : vector<2x24xf32>, vector<2x24xf32> -> vector<2x48xf32>
    %c0_108 = arith.constant 0 : index
    %c0_109 = arith.constant 0 : index
    %156 = vector.load %arg9[%c0_108, %c0_109] : memref<48x50xf32, #tpu.memory_space<vmem>>, vector<48x50xf32>
    %cst_110 = arith.constant dense<0.000000e+00> : vector<2x50xf32>
    %157 = tpu.matmul %155, %156, %cst_110 {dimension_numbers = #tpu.dot_dimension_numbers<[1], [0], [0], [1], [0, 0, 1, 1], [], []>} : vector<2x48xf32>, vector<48x50xf32>, vector<2x50xf32> -> vector<2x50xf32>
    %c0_111 = arith.constant 0 : index
    %c0_112 = arith.constant 0 : index
    %158 = vector.load %arg10[%c0_111, %c0_112] : memref<1x50xf32, #tpu.memory_space<vmem>>, vector<1x50xf32>
    %159 = vector.broadcast %158 : vector<1x50xf32> to vector<2x50xf32>
    %160 = arith.addf %157, %159 : vector<2x50xf32>
    %c0_113 = arith.constant 0 : index
    %c0_114 = arith.constant 0 : index
    %161 = vector.load %arg11[%c0_113, %c0_114] : memref<1x50xf32, #tpu.memory_space<vmem>>, vector<1x50xf32>
    %162 = vector.broadcast %161 : vector<1x50xf32> to vector<2x50xf32>
    %163 = arith.mulf %160, %162 : vector<2x50xf32>
    %cst_115 = arith.constant dense<0.000000e+00> : vector<2xf32>
    %164 = vector.multi_reduction <add>, %163, %cst_115 [1] : vector<2x50xf32> to vector<2xf32>
    %165 = vector.shape_cast %164 : vector<2xf32> to vector<2x1xf32>
    %c0_116 = arith.constant 0 : index
    %c0_117 = arith.constant 0 : index
    %166 = vector.load %arg12[%c0_116, %c0_117] : memref<1x1xf32, #tpu.memory_space<vmem>>, vector<1x1xf32>
    %167 = vector.broadcast %166 : vector<1x1xf32> to vector<2x1xf32>
    %168 = arith.addf %165, %167 : vector<2x1xf32>
    %c0_118 = arith.constant 0 : index
    %c0_119 = arith.constant 0 : index
    %169 = vector.load %arg13[%c0_118, %c0_119] : memref<3x128xf32, #tpu.memory_space<vmem>>, vector<3x128xf32>
    %170 = vector.extract_strided_slice %169 {offsets = [0, 0], sizes = [1, 128], strides = [1, 1]} : vector<3x128xf32> to vector<1x128xf32>
    %171 = vector.broadcast %168 : vector<2x1xf32> to vector<2x128xf32>
    %172 = vector.broadcast %170 : vector<1x128xf32> to vector<2x128xf32>
    %173 = arith.mulf %171, %172 : vector<2x128xf32>
    %c0_120 = arith.constant 0 : index
    %c0_121 = arith.constant 0 : index
    %174 = vector.load %arg7[%c0_120, %c0_121] : memref<2x1xf32, #tpu.memory_space<vmem>>, vector<2x1xf32>
    %175 = vector.extract_strided_slice %169 {offsets = [1, 0], sizes = [1, 128], strides = [1, 1]} : vector<3x128xf32> to vector<1x128xf32>
    %176 = vector.broadcast %174 : vector<2x1xf32> to vector<2x128xf32>
    %177 = vector.broadcast %175 : vector<1x128xf32> to vector<2x128xf32>
    %178 = arith.mulf %176, %177 : vector<2x128xf32>
    %179 = arith.addf %173, %178 : vector<2x128xf32>
    %c0_122 = arith.constant 0 : index
    %c0_123 = arith.constant 0 : index
    %180 = vector.load %arg8[%c0_122, %c0_123] : memref<2x1xf32, #tpu.memory_space<vmem>>, vector<2x1xf32>
    %181 = vector.extract_strided_slice %169 {offsets = [2, 0], sizes = [1, 128], strides = [1, 1]} : vector<3x128xf32> to vector<1x128xf32>
    %182 = vector.broadcast %180 : vector<2x1xf32> to vector<2x128xf32>
    %183 = vector.broadcast %181 : vector<1x128xf32> to vector<2x128xf32>
    %184 = arith.mulf %182, %183 : vector<2x128xf32>
    %185 = arith.addf %179, %184 : vector<2x128xf32>
    %c0_124 = arith.constant 0 : index
    %c0_125 = arith.constant 0 : index
    %186 = vector.load %arg14[%c0_124, %c0_125] : memref<1x128xf32, #tpu.memory_space<vmem>>, vector<1x128xf32>
    %187 = vector.broadcast %186 : vector<1x128xf32> to vector<2x128xf32>
    %188 = arith.addf %185, %187 : vector<2x128xf32>
    %c0_126 = arith.constant 0 : index
    %c0_127 = arith.constant 0 : index
    %189 = vector.load %arg15[%c0_126, %c0_127] : memref<2x128xf32, #tpu.memory_space<vmem>>, vector<2x128xf32>
    tpu.vector_store %arg15[%c0_126, %c0_127], %188 {strides = array<i32>} : memref<2x128xf32, #tpu.memory_space<vmem>>, vector<2x128xf32>,
    return
  }
}

</mosaic_0001>

<bundles_post_ra>
// kernel: deeploc_forward.1
= control target key start
LH: loop header
LB: loop body
LE: loop exit
PB: predicated region body
PF: predicated region fallthrough
CT: control target
= control target key end

     0   :  { %s2893_s0 = inlined_call_operand.vmem [shape: f32[2,18,16], index: 0, kind: input, shape index: {}]   ;;  %s2894_s1 = inlined_call_operand.vmem [shape: f32[2,16,16], index: 1, kind: input, shape index: {}]   ;;  %s2895_s2 = inlined_call_operand.vmem [shape: f32[5,16,24], index: 2, kind: input, shape index: {}]   ;;  %s2896_s3 = inlined_call_operand.vmem [shape: f32[1,24], index: 3, kind: input, shape index: {}]   ;;  %s2897_s4 = inlined_call_operand.vmem [shape: f32[5,16,24], index: 4, kind: input, shape index: {}]   ;;  %s2898_s5 = inlined_call_operand.vmem [shape: f32[1,24], index: 5, kind: input, shape index: {}]   ;;  %s2899_s6 = inlined_call_operand.vmem [shape: s32[1,24], index: 6, kind: input, shape index: {}]   ;;  %s2900_s7 = inlined_call_operand.vmem [shape: f32[2,1], index: 7, kind: input, shape index: {}]   ;;  %s2901_s8 = inlined_call_operand.vmem [shape: f32[2,1], index: 8, kind: input, shape index: {}]   ;;  %s2902_s9 = inlined_call_operand.vmem [shape: f32[48,50], index: 9, kind: input, shape index: {}]   ;;  %s2903_s10 = inlined_call_operand.vmem [shape: f32[1,50], index: 10, kind: input, shape index: {}]   ;;  %s2904_s11 = inlined_call_operand.vmem [shape: f32[1,50], index: 11, kind: input, shape index: {}]   ;;  %s2905_s12 = inlined_call_operand.<no memory space> [shape: f32[1,1], index: 12, kind: input, shape index: {}]   ;;  %s2906_s13 = inlined_call_operand.vmem [shape: f32[3,128], index: 13, kind: input, shape index: {}]   ;;  %s2907_s14 = inlined_call_operand.vmem [shape: f32[1,128], index: 14, kind: input, shape index: {}]   ;;  %s2908_s15 = inlined_call_operand.hbm [shape: f32[2,128], index: 15, kind: output, shape index: {}]  }
   0x1   :  { %v20_v0 = vstv %s2905_s12 }
   0x2   :  { %21 = vst [vmem:[#allocation2] sm:$0x1] %v20_v0 }
   0x3   :  { %v2029_v1 = vld [vmem:[%s2895_s2 + $0x10] sm:$0xff]  ;;  %v2030_v2 = vld [vmem:[%s2895_s2 + $0x18] sm:$0xff]  ;;  %v67_v3 = vld [vmem:[%s2895_s2] sm:$0xff]  ;;  %vm78_vm0 = vcmask 130048   ;;  %vm74_vm1 = vcmask 1046528   ;;  %vm240_vm2 = vcmask 1045504  }
   0x4   :  { %v2339_v4 = vpack.c.bf16 %v2030_v2, %v2029_v1  ;;  %v68_v5 = vld [vmem:[%s2895_s2 + $0x8] sm:$0xff]  ;;  %v2596_v6 = vld [vmem:[%s2893_s0] sm:$0xff]  ;;  %v2610_v11 = vld [vmem:[%s2893_s0 + $0x18] sm:$0xff] }
   0x5   :  { %v2601_v7 = vld [vmem:[%s2893_s0 + $0x8] sm:$0xff]  ;;  %v2343_v8 = vpack.c.bf16 %v68_v5, %v67_v3  ;;  %v75_v9 = vrot.slane %v2596_v6, 1  ;;  %2195 = vmatprep.mubr.msk.f32.mxu0 %vm78_vm0, %v2596_v6  ;;  %v2615_v12 = vld [vmem:[%s2893_s0 + $0x20] sm:$0xff]  ;;  %v535_v14 = vrot.slane %v2610_v11, 1  ;;  %v241_v17 = vrot.slane %v2596_v6, 2  ;;  %v2039_v21 = vld [vmem:[%s2895_s2 + $0x30] sm:$0xff] }
   0x6   :  { %v76_v10 = vrot.slane %v2601_v7, 1  ;;  %v2035_v13 = vld [vmem:[%s2895_s2 + $0x20] sm:$0xff]  ;;  %2340 = vmatprep.subr.bf16.mxu1 %v2339_v4  ;;  %v536_v15 = vrot.slane %v2615_v12, 1  ;;  %v2036_v16 = vld [vmem:[%s2895_s2 + $0x28] sm:$0xff]  ;;  %v242_v18 = vrot.slane %v2601_v7, 2  ;;  %v2040_v22 = vld [vmem:[%s2895_s2 + $0x38] sm:$0xff] }
   0x7   :  { %2344 = vmatprep.subr.bf16.mxu0 %v2343_v8  ;;  %2342 = vmatpush3.bf16.msra.mxu1 %v2339_v4  ;;  %v2347_v20 = vpack.c.bf16 %v2036_v16, %v2035_v13  ;;  %v2351_v25 = vpack.c.bf16 %v2040_v22, %v2039_v21  ;;  %v330_v26 = vrot.slane %v2596_v6, 3  ;;  %v331_v27 = vrot.slane %v2601_v7, 3 }
   0x8   :  { %v77_v19 = vsel %vm74_vm1, %v75_v9, %v76_v10  ;;  %2346 = vmatpush3.bf16.msra.mxu0 %v2343_v8  ;;  %2360 = vmatprep.subr.bf16.mxu1 %v2339_v4  ;;  %v537_v23 = vsel %vm74_vm1, %v535_v14, %v536_v15  ;;  %v243_v24 = vsel %vm240_vm2, %v241_v17, %v242_v18 }
   0x9   :  { %2188 = vmatprep.mubr.msk.f32.mxu1 %vm78_vm0, %v77_v19  ;;  %2348 = vmatprep.subr.bf16.mxu0 %v2347_v20 }
   0xa   :  { %2189 = vmatmul.mubr.msk.f32.vlgmr.msra.gmra.mrb[0].mxu1 %vm78_vm0, %v76_v10 }
   0xb   :  { %2196 = vmatmul.mubr.msk.f32.vlgmr.msra.gmra.mrb[0].mxu0 %vm78_vm0, %v2601_v7  ;;  %2362 = vmatpush3.bf16.msra.mxu1 %v2339_v4 }
   0xc   :  { %2223 = vmatprep.mubr.msk.f32.mxu1 %vm78_vm0, %v537_v23  ;;  %2364 = vmatprep.subr.bf16.mxu1 %v2343_v8 }
   0xd   :  { %2350 = vmatpush3.bf16.msra.mxu0 %v2347_v20  ;;  %2202 = vmatprep.mubr.msk.f32.mxu0 %vm78_vm0, %v243_v24 }
   0xe   :  { %22 = vsyncpa [#allocation4], 0  ;;  %2224 = vmatmul.mubr.msk.f32.vlgmr.msra.gmra.mrb[2].mxu1 %vm78_vm0, %v536_v15  ;;  %2352 = vmatprep.subr.bf16.mxu0 %v2351_v25  ;;  %vm329_vm3 = vcmask 1044480   ;;  %v2043_v28 = vld [vmem:[%s2895_s2 + $0x40] sm:$0xff]  ;;  %v2044_v29 = vld [vmem:[%s2895_s2 + $0x48] sm:$0xff]  ;;  %v696_v30 = vrot.slane %v2610_v11, 2 }
   0xf   :  { %2366 = vmatpush3.bf16.msra.mxu1 %v2343_v8  ;;  %2230 = vmatprep.mubr.msk.f32.mxu1 %vm78_vm0, %v2610_v11  ;;  %v697_v31 = vrot.slane %v2615_v12, 2  ;;  %v332_v32 = vsel %vm329_vm3, %v330_v26, %v331_v27  ;;  %v66_v33 = vld [vmem:[%s2893_s0 + $0x10] sm:$0x3]  ;;  %v2355_v34 = vpack.c.bf16 %v2044_v29, %v2043_v28  ;;  %v420_v37 = vrot.slane %v2596_v6, 4  ;;  %v2062_v40 = vld [vmem:[%s2897_s4 + $0x18] sm:$0xff]  ;;  %v2680_v46 = vld [vmem:[%s2894_s1] sm:$0xff] }
  0x10   :  { %2368 = vmatprep.subr.bf16.mxu1 %v2347_v20  ;;  %v333_v35 = vrot.slane %v66_v33, 3  ;;  %v421_v38 = vrot.slane %v2601_v7, 4  ;;  %vm419_vm4 = vcmask 1043456   ;;  %v2061_v39 = vld [vmem:[%s2897_s4 + $0x10] sm:$0xff]  ;;  %v781_v42 = vrot.slane %v2610_v11, 3  ;;  %v2685_v47 = vld [vmem:[%s2894_s1 + $0x8] sm:$0xff] }
  0x11   :  { %v698_v36 = vsel %vm240_vm2, %v696_v30, %v697_v31  ;;  %v782_v43 = vrot.slane %v2615_v12, 3  ;;  %v2379_v45 = vpack.c.bf16 %v2062_v40, %v2061_v39  ;;  %v423_v48 = vrot.slane %v66_v33, 4  ;;  %v2050_v50 = vld [vmem:[%s2893_s0 + $0x28] sm:$0x3]  ;;  %v973_v53 = vld [vmem:[%s2897_s4] sm:$0xff]  ;;  %v2721_v1 = vld [vmem:[%s2894_s1 + $0x10] sm:$0xff] }
  0x12   :  { %v334_v41 = vsel %vm329_vm3, %v331_v27, %v333_v35  ;;  %v422_v44 = vsel %vm419_vm4, %v420_v37, %v421_v38  ;;  %v980_v51 = vrot.slane %v2680_v46, 1  ;;  %v981_v52 = vrot.slane %v2685_v47, 1  ;;  %v974_v54 = vld [vmem:[%s2897_s4 + $0x8] sm:$0xff]  ;;  %v2067_v62 = vld [vmem:[%s2897_s4 + $0x20] sm:$0xff]  ;;  %v2726_v2 = vld [vmem:[%s2894_s1 + $0x18] sm:$0xff]  ;;  %s2497_s29 = smov [#allocation3]  }
  0x13   :  { %2203 = vmatmul.mubr.msk.f32.vlgmr.msra.gmra.mrb[0].mxu0 %vm78_vm0, %v242_v18  ;;  %v783_v49 = vsel %vm329_vm3, %v781_v42, %v782_v43  ;;  %v784_v55 = vrot.slane %v2050_v50, 3  ;;  %v424_v56 = vsel %vm419_vm4, %v421_v38, %v423_v48  ;;  %v2383_v58 = vpack.c.bf16 %v974_v54, %v973_v53  ;;  %v2068_v63 = vld [vmem:[%s2897_s4 + $0x28] sm:$0xff]  ;;  %v2071_v10 = vld [vmem:[%s2897_s4 + $0x30] sm:$0xff]  ;;  %v2075_v17 = vld [vmem:[%s2897_s4 + $0x40] sm:$0xff]  ;;  %s2020_s0 = sshll.u32 %s2497_s29, 4  ;;  %s2021_s0 = int_to_ptr.vmem [resolvable:$true] %s2020_s0 }
  0x14   :  { %2354 = vmatpush3.bf16.msra.mxu0 %v2351_v25  ;;  %2209 = vmatprep.mubr.msk.f32.mxu0 %vm78_vm0, %v332_v32  ;;  %v982_v57 = vsel %vm74_vm1, %v980_v51, %v981_v52  ;;  %v867_v59 = vrot.slane %v2610_v11, 4  ;;  %v868_v60 = vrot.slane %v2615_v12, 4  ;;  %v2387_v3 = vpack.c.bf16 %v2068_v63, %v2067_v62  ;;  %v2072_v11 = vld [vmem:[%s2897_s4 + $0x38] sm:$0xff]  ;;  %v2076_v18 = vld [vmem:[%s2897_s4 + $0x48] sm:$0xff]  ;;  %v1863_v33 = vld [vmem:[%s2902_s9] sm:$0xff]  ;;  %p2473_p1 = scmp.lt.s32.totalorder %s2021_s0, %s2021_s0 }
  0x15   :  { %2356 = vmatprep.subr.bf16.mxu0 %v2355_v34  ;;  %v785_v61 = vsel %vm329_vm3, %v782_v43, %v784_v55  ;;  %v870_v4 = vrot.slane %v2050_v50, 4  ;;  %v1429_v5 = vrot.slane %v2721_v1, 1  ;;  %v1430_v6 = vrot.slane %v2726_v2, 1  ;;  %v1865_v35 = vld [vmem:[%s2902_s9 + $0x10] sm:$0xff]  ;;  %v1866_v38 = vld [vmem:[%s2902_s9 + $0x18] sm:$0xff]  ;;  %v1867_v40 = vld [vmem:[%s2902_s9 + $0x20] sm:$0xff] }
  0x16   :  { %2231 = vmatmul.mubr.msk.f32.vlgmr.msra.gmra.mrb[2].mxu1 %vm78_vm0, %v2615_v12  ;;  %v869_v0 = vsel %vm419_vm4, %v867_v59, %v868_v60  ;;  %v1144_v7 = vrot.slane %v2680_v46, 2  ;;  %v1145_v8 = vrot.slane %v2685_v47, 2  ;;  %v2391_v14 = vpack.c.bf16 %v2072_v11, %v2071_v10  ;;  %v2047_v48 = vld [vmem:[%s2896_s3] ss:$0 sm:$0xff] }
  0x17   :  { %2370 = vmatpush3.bf16.msra.mxu1 %v2347_v20  ;;  %2237 = vmatprep.mubr.msk.f32.mxu1 %vm78_vm0, %v698_v36  ;;  %v871_v9 = vsel %vm419_vm4, %v868_v60, %v870_v4  ;;  %v1431_v12 = vsel %vm74_vm1, %v1429_v5, %v1430_v6  ;;  %v1231_v15 = vrot.slane %v2680_v46, 3  ;;  %v1232_v16 = vrot.slane %v2685_v47, 3  ;;  %v2816_v50 = vld [vmem:[%s2899_s6] ss:$0 sm:$0xff] }
  0x18   :  { %2372 = vmatprep.subr.bf16.mxu1 %v2351_v25  ;;  %v1146_v13 = vsel %vm240_vm2, %v1144_v7, %v1145_v8  ;;  %v1590_v19 = vrot.slane %v2721_v1, 2  ;;  %v1591_v20 = vrot.slane %v2726_v2, 2  ;;  %v2395_v22 = vpack.c.bf16 %v2076_v18, %v2075_v17 }
  0x19   :  { %v1233_v21 = vsel %vm329_vm3, %v1231_v15, %v1232_v16  ;;  %v1318_v24 = vrot.slane %v2680_v46, 4  ;;  %v1674_v26 = vrot.slane %v2721_v1, 3  ;;  %v1675_v27 = vrot.slane %v2726_v2, 3 }
  0x1a   :  { %v1592_v23 = vsel %vm240_vm2, %v1590_v19, %v1591_v20  ;;  %v1758_v30 = vrot.slane %v2721_v1, 4  ;;  %v2492_v36 = vmov 0.0|0.0   ;;  %v2423_v39 = vpack.c.bf16 %v1866_v38, %v1865_v35 }
  0x1b   :  { %2210 = vmatmul.mubr.msk.f32.vlgmr.msra.gmra.mrb[0].mxu0 %vm78_vm0, %v334_v41  ;;  %v1676_v29 = vsel %vm329_vm3, %v1674_v26, %v1675_v27  ;;  %v1868_v41 = vld [vmem:[%s2902_s9 + $0x28] sm:$0xff]  ;;  %vm520_vm7 = vcmask 193536   ;;  %vm518_vm8 = vcmask 195584   ;;  %vm968_vm9 = vcmask 1040384  }
  0x1c   :  { %2358 = vmatpush3.bf16.msra.mxu0 %v2355_v34  ;;  %2216 = vmatprep.mubr.msk.f32.mxu0 %vm78_vm0, %v422_v44  ;;  %v2426_v42 = vpack.c.bf16 %v1868_v41, %v1867_v40  ;;  %vm1415_vm10 = vcmask 191488   ;;  %vm2493_vm11 = vmmov 0   ;;  %vm1876_vm12 = vcmask 392192  }
  0x1d   :  { %2380 = vmatprep.subr.bf16.mxu0 %v2379_v45  ;;  %vm1958_vm13 = vcmask 402432  }
  0x1e   :  { %2238 = vmatmul.mubr.msk.f32.vlgmr.msra.gmra.mrb[2].mxu1 %vm78_vm0, %v697_v31  ;;  %v1759_v31 = vrot.slane %v2726_v2, 4 }
  0x1f   :  { %2374 = vmatpush3.bf16.msra.mxu1 %v2351_v25  ;;  %2244 = vmatprep.mubr.msk.f32.mxu1 %vm78_vm0, %v783_v49  ;;  %v1319_v25 = vrot.slane %v2685_v47, 4 }
  0x20   :  { %2376 = vmatprep.subr.bf16.mxu1 %v2355_v34  ;;  %v1760_v32 = vsel %vm419_vm4, %v1758_v30, %v1759_v31 }
  0x21   :  { %v1320_v28 = vsel %vm419_vm4, %v1318_v24, %v1319_v25 }
  0x23   :  { %2217 = vmatmul.mubr.msk.f32.vlgmr.msra.gmra.mrb[0].mxu0 %vm78_vm0, %v424_v56 }
  0x24   :  { %2382 = vmatpush3.bf16.msra.mxu0 %v2379_v45  ;;  %2258 = vmatprep.mubr.msk.f32.mxu0 %vm78_vm0, %v982_v57 }
  0x25   :  { %2384 = vmatprep.subr.bf16.mxu0 %v2383_v58 }
  0x26   :  { %2245 = vmatmul.mubr.msk.f32.vlgmr.msra.gmra.mrb[2].mxu1 %vm78_vm0, %v785_v61 }
  0x27   :  { %2259 = vmatmul.mubr.msk.f32.vlgmr.msra.gmra.mrb[2].mxu0 %vm78_vm0, %v981_v52  ;;  %2378 = vmatpush3.bf16.msra.mxu1 %v2355_v34  ;;  %v1864_v34 = vld [vmem:[%s2902_s9 + $0x8] sm:$0xff] }
  0x28   :  { %2386 = vmatpush3.bf16.msra.mxu0 %v2383_v58  ;;  %2251 = vmatprep.mubr.msk.f32.mxu1 %vm78_vm0, %v869_v0  ;;  %v2420_v37 = vpack.c.bf16 %v1864_v34, %v1863_v33 }
  0x29   :  { %2265 = vmatprep.mubr.msk.f32.mxu0 %vm78_vm0, %v2680_v46  ;;  %2400 = vmatprep.subr.bf16.mxu1 %v2379_v45 }
  0x2a   :  { %2388 = vmatprep.subr.bf16.mxu0 %v2387_v3 }
  0x2e   :  { %2252 = vmatmul.mubr.msk.f32.vlgmr.msra.gmra.mrb[2].mxu1 %vm78_vm0, %v871_v9 }
  0x2f   :  { %2266 = vmatmul.mubr.msk.f32.vlgmr.msra.gmra.mrb[2].mxu0 %vm78_vm0, %v2685_v47  ;;  %2402 = vmatpush3.bf16.msra.mxu1 %v2379_v45  ;;  %v54_v45 = vlaneseq }
  0x30   :  { %2293 = vmatprep.mubr.msk.f32.mxu1 %vm78_vm0, %v1431_v12  ;;  %2404 = vmatprep.subr.bf16.mxu1 %v2383_v58 }
  0x31   :  { %2390 = vmatpush3.bf16.msra.mxu0 %v2387_v3  ;;  %2272 = vmatprep.mubr.msk.f32.mxu0 %vm78_vm0, %v1146_v13  ;;  %v2805_v46 = vshrl.u32 %v54_v45, 7 }
  0x32   :  { %2294 = vmatmul.mubr.msk.f32.vlgmr.msra.gmra.mrb[4].mxu1 %vm78_vm0, %v1430_v6  ;;  %2392 = vmatprep.subr.bf16.mxu0 %v2391_v14 }
  0x33   :  { %2406 = vmatpush3.bf16.msra.mxu1 %v2383_v58  ;;  %2300 = vmatprep.mubr.msk.f32.mxu1 %vm78_vm0, %v2721_v1  ;;  %v2808_v47 = vadd.s32 8, %v2805_v46  ;;  %vm61_vm6 = vcmp.ge.s32.totalorder %v2805_v46, %v2816_v50 }
  0x34   :  { %2408 = vmatprep.subr.bf16.mxu1 %v2387_v3 }
  0x35   :  { %vm62_vm5 = vcmp.ge.s32.totalorder %v2808_v47, %v2816_v50 }
  0x37   :  { %2273 = vmatmul.mubr.msk.f32.vlgmr.msra.gmra.mrb[2].mxu0 %vm78_vm0, %v1145_v8 }
  0x38   :  { %2394 = vmatpush3.bf16.msra.mxu0 %v2391_v14  ;;  %2279 = vmatprep.mubr.msk.f32.mxu0 %vm78_vm0, %v1233_v21 }
  0x39   :  { %2396 = vmatprep.subr.bf16.mxu0 %v2395_v22 }
  0x3a   :  { %2301 = vmatmul.mubr.msk.f32.vlgmr.msra.gmra.mrb[4].mxu1 %vm78_vm0, %v2726_v2 }
  0x3b   :  { %2410 = vmatpush3.bf16.msra.mxu1 %v2387_v3  ;;  %2307 = vmatprep.mubr.msk.f32.mxu1 %vm78_vm0, %v1592_v23  ;;  %v2079_v23 = vld [vmem:[%s2898_s5] ss:$0 sm:$0xff]  ;;  %s2495_s5 = smov 24  }
  0x3c   :  { %2412 = vmatprep.subr.bf16.mxu1 %v2391_v14 }
  0x3f   :  { %2280 = vmatmul.mubr.msk.f32.vlgmr.msra.gmra.mrb[2].mxu0 %vm78_vm0, %v1232_v16 }
  0x40   :  { %2398 = vmatpush3.bf16.msra.mxu0 %v2395_v22  ;;  %2286 = vmatprep.mubr.msk.f32.mxu0 %vm78_vm0, %v1320_v28 }
  0x41   :  { %2419 = vmatprep.subr.bf16.mxu0 %v2492_v36 }
  0x42   :  { %2308 = vmatmul.mubr.msk.f32.vlgmr.msra.gmra.mrb[4].mxu1 %vm78_vm0, %v1591_v20 }
  0x43   :  { %2414 = vmatpush3.bf16.msra.mxu1 %v2391_v14  ;;  %2314 = vmatprep.mubr.msk.f32.mxu1 %vm78_vm0, %v1676_v29 }
  0x44   :  { %2416 = vmatprep.subr.bf16.mxu1 %v2395_v22 }
  0x47   :  { %2287 = vmatmul.mubr.msk.f32.vlgmr.msra.gmra.mrb[2].mxu0 %vm78_vm0, %v1319_v25 }
  0x48   :  { %2421 = vmatpush3.bf16.msra.mxu0 %v2420_v37 }
  0x49   :  { %2422 = vmatprep.subr.bf16.mxu0 %v2492_v36 }
  0x4a   :  { %2315 = vmatmul.mubr.msk.f32.vlgmr.msra.gmra.mrb[4].mxu1 %vm78_vm0, %v1675_v27 }
  0x4b   :  { %2418 = vmatpush3.bf16.msra.mxu1 %v2395_v22  ;;  %2321 = vmatprep.mubr.msk.f32.mxu1 %vm78_vm0, %v1760_v32 }
  0x4c   :  { %2424 = vmatpush3.bf16.msra.mxu0 %v2423_v39 }
  0x4d   :  { %2425 = vmatprep.subr.bf16.mxu0 %v2492_v36 }
  0x50   :  { %2427 = vmatpush3.bf16.msra.mxu0 %v2426_v42 }
  0x52   :  { %2322 = vmatmul.mubr.msk.f32.vlgmr.msra.gmra.mrb[4].mxu1 %vm78_vm0, %v1759_v31 }
  0xdd   :  { %v2190_v43 = vpop.f32.mrb[0].mxu1 }
  0xde   :  { %v149_v44 = vpop.f32.mrb[1].mxu1 }
  0xf6   :  { %v2218_v49 = vpop.f32.mrb[0].mxu0 }
  0xf7   :  { %v2428_v51 = vadd.f32 %v2218_v49, %v2190_v43  ;;  %v495_v52 = vpop.f32.mrb[1].mxu0 }
  0xf8   :  { %v2429_v53 = vadd.f32 %v495_v52, %v149_v44 }
  0xf9   :  { %v513_v54 = vadd.f32 %v2428_v51, %v2047_v48 }
  0xfa   :  { %v512_v55 = vadd.f32 %v2429_v53, %v2047_v48  ;;  %v2494_v53 = vmov 0.0  }
  0xfb   :  { %v515_v56 = vmax.f32 %v513_v54, 0.0  ;;  %2336 = vmatprep.mubr.msk.f32.mxu0 %vm2493_vm11, %v2494_v53 }
  0xfc   :  { %v514_v57 = vmax.f32 %v512_v55, 0.0 }
  0xfd   :  { %v517_v58 = vsel %vm62_vm5, %v515_v56, 0.0 }
  0xfe   :  { %v516_v59 = vsel %vm61_vm6, %v514_v57, 0.0  ;;  %v521_v60 = vsel %vm520_vm7, %v517_v58, -inf }
  0xff   :  { %v519_v61 = vsel %vm518_vm8, %v516_v59, -inf }
 0x100   :  { %v522_v62 = vmax.f32 %v519_v61, %v521_v60 }
 0x101   :  { %v2253_v63 = vpop.f32.mrb[2].mxu1 }
 0x102   :  { %v523_v0 = vrot.slane %v522_v62, 4  ;;  %v954_v1 = vadd.f32 %v2253_v63, %v2047_v48  ;;  %v942_v2 = vpop.f32.mrb[3].mxu1  ;;  %v1981_v63 = vld [vmem:[%s2900_s7] sm:$0x3] }
 0x103   :  { %v953_v3 = vadd.f32 %v2047_v48, %v942_v2 }
 0x104   :  { %v956_v4 = vmax.f32 %v954_v1, 0.0  ;;  %v524_v5 = vmax.f32 %v522_v62, %v523_v0  ;;  %v2496_v0 = vmov 0   ;;  %v2092_v1 = vld [vmem:[%s2903_s10] ss:$0 sm:$0xff] }
 0x105   :  { %v955_v6 = vmax.f32 %v953_v3, 0.0  ;;  %2466 = vset.pattern.permute.xlu1 %v2496_v0  ;;  %2467 = vset.pattern.permute.xlu0 %v2496_v0  ;;  %v2094_v3 = vld [vmem:[%s2904_s11] ss:$0 sm:$0xff] }
 0x106   :  { %v958_v7 = vsel %vm62_vm5, %v956_v4, 0.0  ;;  %v525_v11 = vrot.slane %v524_v5, 2  ;;  %1984 = vperm.xlu1 %2466, %v1981_v63  }
 0x107   :  { %v960_v8 = vsel %vm520_vm7, %v958_v7, -inf  ;;  %v957_v9 = vsel %vm61_vm6, %v955_v6, 0.0 }
 0x108   :  { %v959_v10 = vsel %vm518_vm8, %v957_v9, -inf  ;;  %v526_v15 = vmax.f32 %v524_v5, %v525_v11  ;;  %v1993_v11 = vld [vmem:[%s2901_s8] sm:$0x3] }
 0x109   :  { %v961_v12 = vmax.f32 %v959_v10, %v960_v8  ;;  %v2095_v8 = vld [vmem:[#allocation2] ss:$0 sm:$0xff] }
 0x10a   :  { %v527_v18 = vrot.slane %v526_v15, 1 }
 0x10b   :  { %v962_v13 = vrot.slane %v961_v12, 4 }
 0x10c   :  { %v528_v20 = vmax.f32 %v526_v15, %v527_v18  ;;  %v1970_v15 = vld [vmem:[%s2906_s13] sm:$0x7]  ;;  %s2468_s13 = scalar_lea.vmem %s2021_s0, 32 }
 0x10d   :  { %v963_v14 = vmax.f32 %v961_v12, %v962_v13  ;;  %v1978_v12 = vsub.s32 0, %v2805_v46  ;;  %p2469_p0 = scmp.ne.s32.totalorder %s2021_s0, %s2468_s13  ;;  %p2474_p2 = scmp.lt.s32.totalorder %s2468_s13, %s2468_s13 }
 0x10f   :  { %v964_v16 = vrot.slane %v963_v14, 2  ;;  %p2475_p3 = por %p2474_p2, %p2473_p1 }
 0x111   :  { %v965_v17 = vmax.f32 %v963_v14, %v964_v16  ;;  %v1989_v14 = vsub.s32 1, %v2805_v46  ;;  %v1979_v16 = vrot.slane %v1970_v15, %v1978_v12  ;;  %p2476_p4 = pnand %p2475_p3, %p2469_p0 }
 0x113   :  { %v966_v19 = vrot.slane %v965_v17, 1  ;;  %v1990_v18 = vrot.slane %v1970_v15, %v1989_v14 }
 0x115   :  { %v967_v21 = vmax.f32 %v965_v17, %v966_v19  ;;  %v2001_v17 = vsub.s32 2, %v2805_v46 }
 0x117   :  { %v969_v22 = vsel %vm968_vm9, %v528_v20, %v967_v21  ;;  %v2002_v21 = vrot.slane %v1970_v15, %v2001_v17 }
 0x11a   :  { %v2288_v24 = vpop.f32.mrb[2].mxu0 }
 0x11b   :  { %v1409_v25 = vadd.f32 %v2288_v24, %v2079_v23  ;;  %v1391_v26 = vpop.f32.mrb[3].mxu0 }
 0x11c   :  { %v1408_v27 = vadd.f32 %v2079_v23, %v1391_v26  ;;  %v2096_v26 = vld [vmem:[%s2907_s14] ss:$0 sm:$0xff] }
 0x11d   :  { %v1411_v28 = vmax.f32 %v1409_v25, 0.0 }
 0x11e   :  { %v1410_v29 = vmax.f32 %v1408_v27, 0.0 }
 0x11f   :  { %v1413_v30 = vsel %vm62_vm5, %v1411_v28, 0.0 }
 0x120   :  { %v1416_v31 = vsel %vm1415_vm10, %v1413_v30, -inf  ;;  %v1412_v32 = vsel %vm61_vm6, %v1410_v29, 0.0 }
 0x121   :  { %v1414_v33 = vsel %vm518_vm8, %v1412_v32, -inf }
 0x122   :  { %v1417_v34 = vmax.f32 %v1414_v33, %v1416_v31 }
 0x124   :  { %v1418_v35 = vrot.slane %v1417_v34, 4 }
 0x125   :  { %v2323_v36 = vpop.f32.mrb[4].mxu1 }
 0x126   :  { %v1843_v37 = vadd.f32 %v2323_v36, %v2079_v23  ;;  %v1831_v38 = vpop.f32.mrb[5].mxu1  ;;  %v1419_v41 = vmax.f32 %v1417_v34, %v1418_v35 }
 0x127   :  { %v1842_v39 = vadd.f32 %v2079_v23, %v1831_v38 }
 0x128   :  { %v1845_v40 = vmax.f32 %v1843_v37, 0.0  ;;  %v1420_v51 = vrot.slane %v1419_v41, 2 }
 0x129   :  { %v1844_v42 = vmax.f32 %v1842_v39, 0.0 }
 0x12a   :  { %v1847_v43 = vsel %vm62_vm5, %v1845_v40, 0.0  ;;  %v1421_v55 = vmax.f32 %v1419_v41, %v1420_v51 }
 0x12b   :  { %v1849_v44 = vsel %vm1415_vm10, %v1847_v43, -inf  ;;  %v1846_v45 = vsel %vm61_vm6, %v1844_v42, 0.0 }
 0x12c   :  { %v1848_v48 = vsel %vm518_vm8, %v1846_v45, -inf  ;;  %v1422_v57 = vrot.slane %v1421_v55, 1 }
 0x12d   :  { %v1850_v49 = vmax.f32 %v1848_v48, %v1849_v44 }
 0x12e   :  { %v1423_v59 = vmax.f32 %v1421_v55, %v1422_v57 }
 0x12f   :  { %v1851_v52 = vrot.slane %v1850_v49, 4 }
 0x131   :  { %v1852_v54 = vmax.f32 %v1850_v49, %v1851_v52 }
 0x133   :  { %v1853_v56 = vrot.slane %v1852_v54, 2 }
 0x135   :  { %v1854_v47 = vmax.f32 %v1852_v54, %v1853_v56 }
 0x137   :  { %v1855_v58 = vrot.slane %v1854_v47, 1 }
 0x139   :  { %v1856_v60 = vmax.f32 %v1854_v47, %v1855_v58 }
 0x13b   :  { %v1857_v61 = vsel %vm968_vm9, %v1423_v59, %v1856_v60 }
 0x13c   :  { %1859 = vrot.lane.b32.xlu0 %v1857_v61, %s2495_s5 }
 0x185   :  { %v1985_v13 = vpop.permute.xlu1 %1984 }
 0x1ae   :  { %v1860_v50 = vpop.permute.xlu0 %1859 }
 0x1af   :  { %v1862_v62 = vsel %vm518_vm8, %v969_v22, %v1860_v50  ;;  %v1991_v22 = vmul.f32 %v1990_v18, %v1985_v13 }
 0x1b0   :  { %2337 = vmatmul.mubr.msk.f32.vlgmr.msra.gmra.mrb[4].mxu0 %vm1876_vm12, %v1862_v62 }
 0x283   :  { %v1946_v2 = vpop.f32.mrb[4].mxu0 }
 0x284   :  { %v1947_v4 = vadd.f32 %v2092_v1, %v1946_v2  ;;  %v2338_v5 = vpop.f32.mrb[5].mxu0 }
 0x286   :  { %v1957_v6 = vmul.f32 %v2094_v3, %v1947_v4 }
 0x288   :  { %v1959_v7 = vsel %vm1958_vm13, %v1957_v6, 0.0 }
 0x289   :  { %1960 = vadd.xlane.f32.xlu0 %v1959_v7 }
 0x316   :  { %v1961_v9 = vpop.xlane.xlu0 %1960 }
 0x317   :  { %v1969_v10 = vadd.f32 %v2095_v8, %v1961_v9 }
 0x319   :  { %1973 = vperm.xlu1 %2466, %v1969_v10  }
 0x31d   :  { %1996 = vperm.xlu1 %2466, %v1993_v11  }
 0x398   :  { %v1974_v19 = vpop.permute.xlu1 %1973 }
 0x399   :  { %v1980_v20 = vmul.f32 %v1979_v16, %v1974_v19 }
 0x39b   :  { %v1992_v24 = vadd.f32 %v1991_v22, %v1980_v20 }
 0x39c   :  { %v1997_v23 = vpop.permute.xlu1 %1996 }
 0x39d   :  { %v2003_v25 = vmul.f32 %v2002_v21, %v1997_v23 }
 0x39f   :  { %v2004_v27 = vadd.f32 %v2003_v25, %v1992_v24 }
 0x3a1   :  { %v2012_v28 = vadd.f32 %v2096_v26, %v2004_v27 }
 0x3a3   :  { %2013 = vst [vmem:[#allocation3] sm:$0x3] %v2012_v28 }
 0x3a4   :  { %2479 = shalt.err (!%p2476_p4)
}
 0x3a5   :  { %s2480_s17 = scalar_lea.hbm %s2908_s15, 32 }
 0x3a6   :  { %p2481_p5 = scmp.ne.s32.totalorder %s2908_s15, %s2480_s17  ;;  %p2484_p6 = scmp.lt.u32.totalorder %s2480_s17, %s2908_s15 }
 0x3a8   :  { %p2486_p7 = pnand %p2484_p6, %p2481_p5 }
 0x3aa   :  { %2489 = shalt.err (!%p2486_p7)
}
 0x3ab   :  { %2023 = dma.vmem_to_hbm [thread:$0]  %s2021_s0, 32, %s2908_s15, [#allocation4]  }
 0x3ac   :  { %2490 = dma.done.wait [#allocation4], 32  }
 0x3ad   :  { %2491 = vsyncadd [#allocation4], 4294967264 }
 0x3ae   :  { %2027 = vsyncpa [#allocation4], 1 }

</bundles_post_ra>
